<compile_context>
chip_gen: v5e
topology: v5e:2x2
jax: 0.10.0
libtpu: 0.0.40
codegen_flags: <defaults>
</compile_context>

<pallas_src>
import jax
import jax.numpy as jnp
from jax.experimental import pallas as pl
from jax.experimental.pallas import tpu as pltpu


def _round_up(a, b):
    return (a + b - 1) // b * b


def _device_defaults():
    """Per-generation tile / VMEM defaults.  Arithmetic intensity of the kernel
    is ~tm FLOP per HBM byte of weight traffic, so tm is the lever that moves
    prefill from bandwidth-bound to MXU-bound; ti >= 512 is enough for MXU
    efficiency and mainly amortizes per-grid-step overhead."""
    try:
        kind = jax.devices()[0].device_kind.lower()
    except Exception:
        kind = ""
    if "v5" in kind:   # 128 MiB VMEM, ridge ~240 FLOP/B -> tm=256 already near compute-bound
        return dict(tm=256, ti=2048, vmem_limit_bytes=100 * 1024 * 1024)
    if "v6" in kind:   # 128 MiB VMEM, ridge ~620 FLOP/B -> larger tm
        return dict(tm=512, ti=1024, vmem_limit_bytes=100 * 1024 * 1024)
    if "v7" in kind:   # 64 MiB VMEM -> tm=512 with ti=512 fits double-buffered weights
        return dict(tm=512, ti=512, vmem_limit_bytes=54 * 1024 * 1024)
    return dict(tm=256, ti=512, vmem_limit_bytes=None)


def _mlp_kernel(x_ref, gu_w_ref, down_w_ref, o_ref, acc_ref):
    # x_ref:      (tm, H)        activation tile (resident across the I axis)
    # gu_w_ref:   (H, 2*ti)      [gate | up] weight slice j (contraction dim leading)
    # down_w_ref: (ti, H)        down-proj weight slice j   (contraction dim leading)
    # o_ref:      (tm, H)        output tile
    # acc_ref:    (tm, H) f32    accumulator over the I (reduction) grid axis
    j = pl.program_id(1)
    ti = down_w_ref.shape[0]

    # Fused gate+up projection in one MXU pass: (tm,H) @ (H,2ti) -> (tm,2ti), f32 acc.
    gu = jnp.dot(x_ref[...], gu_w_ref[...], preferred_element_type=jnp.float32)
    gate = gu[:, :ti]
    up = gu[:, ti:]
    h = (gate * jax.nn.sigmoid(gate)) * up          # SiLU(gate) * up

    # Partial down projection for this I slice: (tm,ti) @ (ti,H) -> (tm,H).
    partial = jnp.dot(h.astype(down_w_ref.dtype), down_w_ref[...],
                      preferred_element_type=jnp.float32)

    @pl.when(j == 0)
    def _first():            # write-on-first-step: no zero-fill, no read-modify-write
        acc_ref[...] = partial

    @pl.when(j > 0)
    def _rest():
        acc_ref[...] += partial

    @pl.when(j == pl.num_programs(1) - 1)
    def _finalize():
        o_ref[...] = acc_ref[...].astype(o_ref.dtype)


def pack_mlp_weights(gate_w, up_w, down_w, *, ti=None):
    """Pre-pack nn.Linear-layout weights ONCE at weight-load time.

    gate_w/up_w: [I, H], down_w: [H, I].
    Returns (gu_packed [n_i, H, 2*ti], down_packed [n_i, ti, H]).
    I is zero-padded up to a multiple of ti; padded rows contribute exactly 0.
    """
    I, H = gate_w.shape
    if ti is None:
        ti = _device_defaults()["ti"]
    ti = max(128, (int(ti) // 128) * 128)
    ti_eff = min(ti, _round_up(I, 128))
    Ip = _round_up(I, ti_eff)
    n_i = Ip // ti_eff
    pad = Ip - I

    g_t = jnp.pad(gate_w, ((0, pad), (0, 0))).T          # (H, Ip)
    u_t = jnp.pad(up_w, ((0, pad), (0, 0))).T            # (H, Ip)
    d_t = jnp.pad(down_w, ((0, 0), (0, pad))).T          # (Ip, H)

    gu_packed = jnp.concatenate(
        [g_t.reshape(H, n_i, ti_eff).transpose(1, 0, 2),
         u_t.reshape(H, n_i, ti_eff).transpose(1, 0, 2)],
        axis=-1)                                          # (n_i, H, 2*ti): contiguous slabs
    down_packed = d_t.reshape(n_i, ti_eff, H)             # (n_i, ti, H):   contiguous slabs
    return gu_packed, down_packed


def neuron_llama_mlp_packed(x, gu_packed, down_packed, *, tm=None,
                            vmem_limit_bytes="auto",
                            weight_buffers=None, x_buffers=None):
    """Run the MLP on pre-packed weights.  x: [B, S, H] -> [B, S, H]."""
    defaults = _device_defaults()
    if tm is None:
        tm = defaults["tm"]
    if vmem_limit_bytes == "auto":
        vmem_limit_bytes = defaults["vmem_limit_bytes"]

    B, S, H = x.shape
    n_i, _, two_ti = gu_packed.shape
    ti = two_ti // 2
    Ip = n_i * ti
    M = B * S
    out_dtype = x.dtype

    # Sublane packing: 8 rows (f32), 16 (bf16), 32 (int8/fp8).
    sub = 8 * max(1, 4 // jnp.dtype(x.dtype).itemsize)
    tm_eff = _round_up(min(int(tm), _round_up(M, sub)), sub)
    Mp = _round_up(M, tm_eff)
    n_m = Mp // tm_eff

    x2d = x.reshape(M, H)
    if Mp != M:
        x2d = jnp.pad(x2d, ((0, Mp - M), (0, 0)))   # zero rows -> zero outputs, sliced off

    def _spec(shape, imap, buffers):
        if buffers is None:
            return pl.BlockSpec(shape, imap)
        return pl.BlockSpec(shape, imap, pipeline_mode=pl.Buffered(buffers))

    w_bytes = jnp.dtype(gu_packed.dtype).itemsize
    x_bytes = jnp.dtype(x.dtype).itemsize
    cost = pl.CostEstimate(
        flops=int(6 * M * H * Ip),
        transcendentals=int(M * Ip),
        bytes_accessed=int(n_m * 3 * H * Ip * w_bytes + 2 * M * H * x_bytes),
    )

    compiler_kwargs = dict(dimension_semantics=("parallel", "arbitrary"))
    if vmem_limit_bytes is not None:
        compiler_kwargs["vmem_limit_bytes"] = int(vmem_limit_bytes)

    out2d = pl.pallas_call(
        _mlp_kernel,
        out_shape=jax.ShapeDtypeStruct((Mp, H), out_dtype),
        grid_spec=pltpu.PrefetchScalarGridSpec(
            num_scalar_prefetch=0,
            grid=(n_m, n_i),                                  # M tiles outer, I reduction inner/last
            in_specs=[
                _spec((tm_eff, H), lambda i, j: (i, 0), x_buffers),          # x tile (resident over j)
                _spec((None, H, 2 * ti), lambda i, j: (j, 0, 0), weight_buffers),  # [gate|up] slab j
                _spec((None, ti, H), lambda i, j: (j, 0, 0), weight_buffers),      # down slab j
            ],
            out_specs=pl.BlockSpec((tm_eff, H), lambda i, j: (i, 0)),
            scratch_shapes=[pltpu.VMEM((tm_eff, H), jnp.float32)],
        ),
        compiler_params=pltpu.CompilerParams(**compiler_kwargs),
        cost_estimate=cost,
    )(x2d, gu_packed, down_packed)

    if Mp != M:
        out2d = out2d[:M]
    return out2d.reshape(B, S, H)


def neuron_llama_mlp(x, gate_w, up_w, down_w, *, tm=None, ti=None,
                     vmem_limit_bytes="auto"):
    """Forward of NeuronLlamaMLP (native path): returns (output, residual=None).

    For production, call pack_mlp_weights() once at weight-load time and use
    neuron_llama_mlp_packed() per step; this convenience wrapper packs per call.
    """
    gu_packed, down_packed = pack_mlp_weights(gate_w, up_w, down_w, ti=ti)
    out = neuron_llama_mlp_packed(x, gu_packed, down_packed, tm=tm,
                                  vmem_limit_bytes=vmem_limit_bytes)
    # TODO(synk): TP collectives (reduce / reduce-scatter), sequence-parallel
    # gather, fused rmsnorm + residual-add, the fp8-quantized kernel path, and a
    # v7x decode-mode CORE_PARALLEL split of the I reduction are not implemented.
    return out, None


def _reference_mlp(x, gate_w, up_w, down_w):
    gate = jnp.einsum("bsh,ih->bsi", x, gate_w)
    up = jnp.einsum("bsh,ih->bsi", x, up_w)
    h = jax.nn.silu(gate) * up
    return jnp.einsum("bsi,hi->bsh", h, down_w)


if __name__ == "__main__":
    key = jax.random.PRNGKey(0)

    # ---- test 1: tiny f32 (module-consistent shapes, mlp_bias=False) --------
    B, S, H, I = 2, 8, 32, 64
    kx, kg, ku, kd, kx2, kg2, ku2, kd2 = jax.random.split(key, 8)
    x = jax.random.normal(kx, (B, S, H), dtype=jnp.float32)
    gate_w = jax.random.normal(kg, (I, H), dtype=jnp.float32) * (1.0 / jnp.sqrt(H))
    up_w = jax.random.normal(ku, (I, H), dtype=jnp.float32) * (1.0 / jnp.sqrt(H))
    down_w = jax.random.normal(kd, (H, I), dtype=jnp.float32) * (1.0 / jnp.sqrt(I))

    out, residual = neuron_llama_mlp(x, gate_w, up_w, down_w)
    out = jax.block_until_ready(out)
    ref = _reference_mlp(x, gate_w, up_w, down_w)
    assert residual is None
    assert out.shape == (B, S, H)
    assert jnp.allclose(out, ref, atol=1e-4, rtol=1e-4), "f32 mismatch vs reference"

    # ---- test 2: bf16, M not a multiple of tm, I not a multiple of ti, ------
    # ---- multiple M and I tiles (exercises padding + accumulator path) ------
    B2, S2, H2, I2 = 2, 19, 256, 380
    x2 = jax.random.normal(kx2, (B2, S2, H2), dtype=jnp.float32).astype(jnp.bfloat16)
    g2 = (jax.random.normal(kg2, (I2, H2), dtype=jnp.float32) / jnp.sqrt(H2)).astype(jnp.bfloat16)
    u2 = (jax.random.normal(ku2, (I2, H2), dtype=jnp.float32) / jnp.sqrt(H2)).astype(jnp.bfloat16)
    d2 = (jax.random.normal(kd2, (H2, I2), dtype=jnp.float32) / jnp.sqrt(I2)).astype(jnp.bfloat16)

    gu2, dn2 = pack_mlp_weights(g2, u2, d2, ti=128)      # pre-pack once
    out2 = neuron_llama_mlp_packed(x2, gu2, dn2, tm=16)  # n_m=3, n_i=3
    out2 = jax.block_until_ready(out2)
    ref2 = _reference_mlp(x2.astype(jnp.float32), g2.astype(jnp.float32),
                          u2.astype(jnp.float32), d2.astype(jnp.float32))
    assert out2.shape == (B2, S2, H2) and out2.dtype == jnp.bfloat16
    assert jnp.allclose(out2.astype(jnp.float32), ref2, atol=8e-2, rtol=8e-2), \
        "bf16 mismatch vs reference"

    print("KERNEL_OK")
</pallas_src>

<mosaic_0001>
module attributes {stable_mosaic.version = 11 : i64} {
  func.func @_mlp_kernel(%arg0: i32, %arg1: i32, %arg2: memref<16x32xf32, #tpu.memory_space<vmem>>, %arg3: memref<1x32x256xf32, #tpu.memory_space<vmem>>, %arg4: memref<1x128x32xf32, #tpu.memory_space<vmem>>, %arg5: memref<16x32xf32, #tpu.memory_space<vmem>>, %arg6: memref<16x32xf32, #tpu.memory_space<vmem>>) attributes {dimension_semantics = [#tpu.dimension_semantics<parallel>, #tpu.dimension_semantics<arbitrary>], iteration_bounds = array<i64: 1, 1>, scalar_prefetch = 0 : i64, scratch_operands = 1 : i64, tpu.core_type = #tpu.core_type<tc>, window_params = [{transform_indices = @transform_0, window_bounds = array<i64: 16, 32>}, {transform_indices = @transform_1, window_bounds = array<i64: 1, 32, 256>}, {transform_indices = @transform_2, window_bounds = array<i64: 1, 128, 32>}, {transform_indices = @transform_3, window_bounds = array<i64: 16, 32>}]} {
    %c0 = arith.constant 0 : index
    %c0_0 = arith.constant 0 : index
    %0 = vector.load %arg2[%c0, %c0_0] : memref<16x32xf32, #tpu.memory_space<vmem>>, vector<16x32xf32>
    %c0_1 = arith.constant 0 : index
    %c0_2 = arith.constant 0 : index
    %c0_3 = arith.constant 0 : index
    %1 = vector.load %arg3[%c0_1, %c0_2, %c0_3] : memref<1x32x256xf32, #tpu.memory_space<vmem>>, vector<1x32x256xf32>
    %2 = vector.shape_cast %1 : vector<1x32x256xf32> to vector<32x256xf32>
    %cst = arith.constant dense<0.000000e+00> : vector<16x256xf32>
    %3 = tpu.matmul %0, %2, %cst {dimension_numbers = #tpu.dot_dimension_numbers<[1], [0], [0], [1], [0, 0, 1, 1], [], []>} : vector<16x32xf32>, vector<32x256xf32>, vector<16x256xf32> -> vector<16x256xf32>
    %4 = vector.extract_strided_slice %3 {offsets = [0, 0], sizes = [16, 128], strides = [1, 1]} : vector<16x256xf32> to vector<16x128xf32>
    %5 = vector.extract_strided_slice %3 {offsets = [0, 128], sizes = [16, 128], strides = [1, 1]} : vector<16x256xf32> to vector<16x128xf32>
    %6 = arith.negf %4 : vector<16x128xf32>
    %7 = math.exp %6 : vector<16x128xf32>
    %cst_4 = arith.constant 1.000000e+00 : f32
    %8 = vector.broadcast %cst_4 : f32 to vector<16x128xf32>
    %9 = arith.addf %8, %7 : vector<16x128xf32>
    %10 = arith.divf %8, %9 : vector<16x128xf32>
    %11 = arith.mulf %4, %10 : vector<16x128xf32>
    %12 = arith.mulf %11, %5 : vector<16x128xf32>
    %c0_5 = arith.constant 0 : index
    %c0_6 = arith.constant 0 : index
    %c0_7 = arith.constant 0 : index
    %13 = vector.load %arg4[%c0_5, %c0_6, %c0_7] : memref<1x128x32xf32, #tpu.memory_space<vmem>>, vector<1x128x32xf32>
    %14 = vector.shape_cast %13 : vector<1x128x32xf32> to vector<128x32xf32>
    %cst_8 = arith.constant dense<0.000000e+00> : vector<16x32xf32>
    %15 = tpu.matmul %12, %14, %cst_8 {dimension_numbers = #tpu.dot_dimension_numbers<[1], [0], [0], [1], [0, 0, 1, 1], [], []>} : vector<16x128xf32>, vector<128x32xf32>, vector<16x32xf32> -> vector<16x32xf32>
    %c0_i32 = arith.constant 0 : i32
    %16 = arith.cmpi eq, %arg1, %c0_i32 : i32
    %17 = arith.extui %16 : i1 to i32
    %c0_i32_9 = arith.constant 0 : i32
    %18 = arith.cmpi ne, %17, %c0_i32_9 : i32
    scf.if %18 {
      %c0_14 = arith.constant 0 : index
      %c0_15 = arith.constant 0 : index
      %25 = vector.load %arg6[%c0_14, %c0_15] : memref<16x32xf32, #tpu.memory_space<vmem>>, vector<16x32xf32>
      tpu.vector_store %arg6[%c0_14, %c0_15], %15 {strides = array<i32>} : memref<16x32xf32, #tpu.memory_space<vmem>>, vector<16x32xf32>,
    } else {
    }
    %c0_i32_10 = arith.constant 0 : i32
    %19 = arith.cmpi sgt, %arg1, %c0_i32_10 : i32
    %20 = arith.extui %19 : i1 to i32
    %c0_i32_11 = arith.constant 0 : i32
    %21 = arith.cmpi ne, %20, %c0_i32_11 : i32
    scf.if %21 {
      %c0_14 = arith.constant 0 : index
      %c0_15 = arith.constant 0 : index
      %25 = vector.load %arg6[%c0_14, %c0_15] : memref<16x32xf32, #tpu.memory_space<vmem>>, vector<16x32xf32>
      %26 = arith.addf %25, %15 : vector<16x32xf32>
      %c0_16 = arith.constant 0 : index
      %c0_17 = arith.constant 0 : index
      %27 = vector.load %arg6[%c0_16, %c0_17] : memref<16x32xf32, #tpu.memory_space<vmem>>, vector<16x32xf32>
      tpu.vector_store %arg6[%c0_16, %c0_17], %26 {strides = array<i32>} : memref<16x32xf32, #tpu.memory_space<vmem>>, vector<16x32xf32>,
    } else {
    }
    %c0_i32_12 = arith.constant 0 : i32
    %22 = arith.cmpi eq, %arg1, %c0_i32_12 : i32
    %23 = arith.extui %22 : i1 to i32
    %c0_i32_13 = arith.constant 0 : i32
    %24 = arith.cmpi ne, %23, %c0_i32_13 : i32
    scf.if %24 {
      %c0_14 = arith.constant 0 : index
      %c0_15 = arith.constant 0 : index
      %25 = vector.load %arg6[%c0_14, %c0_15] : memref<16x32xf32, #tpu.memory_space<vmem>>, vector<16x32xf32>
      %c0_16 = arith.constant 0 : index
      %c0_17 = arith.constant 0 : index
      %26 = vector.load %arg5[%c0_16, %c0_17] : memref<16x32xf32, #tpu.memory_space<vmem>>, vector<16x32xf32>
      tpu.vector_store %arg5[%c0_16, %c0_17], %25 {strides = array<i32>} : memref<16x32xf32, #tpu.memory_space<vmem>>, vector<16x32xf32>,
    } else {
    }
    return
  }
  func.func @transform_0(%arg0: i32, %arg1: i32) -> (i32, i32) {
    %c0_i32 = arith.constant 0 : i32
    %c0_i32_0 = arith.constant 0 : i32
    return %arg0, %c0_i32 : i32, i32
  }
  func.func @transform_1(%arg0: i32, %arg1: i32) -> (i32, i32, i32) {
    %c0_i32 = arith.constant 0 : i32
    %c0_i32_0 = arith.constant 0 : i32
    %c0_i32_1 = arith.constant 0 : i32
    return %arg1, %c0_i32, %c0_i32_0 : i32, i32, i32
  }
  func.func @transform_2(%arg0: i32, %arg1: i32) -> (i32, i32, i32) {
    %c0_i32 = arith.constant 0 : i32
    %c0_i32_0 = arith.constant 0 : i32
    %c0_i32_1 = arith.constant 0 : i32
    return %arg1, %c0_i32, %c0_i32_0 : i32, i32, i32
  }
  func.func @transform_3(%arg0: i32, %arg1: i32) -> (i32, i32) {
    %c0_i32 = arith.constant 0 : i32
    %c0_i32_0 = arith.constant 0 : i32
    return %arg0, %c0_i32 : i32, i32
  }
}

</mosaic_0001>

<bundles_post_ra>
// kernel: tpu_custom_call.1
= control target key start
LH: loop header
LB: loop body
LE: loop exit
PB: predicated region body
PF: predicated region fallthrough
CT: control target
= control target key end

     0   :  { %s371_s0 = inlined_call_operand.vmem [shape: f32[16,32], index: 0, kind: input, shape index: {}]   ;;  %s372_s1 = inlined_call_operand.vmem [shape: f32[1,32,256], index: 1, kind: input, shape index: {}]   ;;  %s373_s2 = inlined_call_operand.vmem [shape: f32[1,128,32], index: 2, kind: input, shape index: {}]   ;;  %s374_s3 = inlined_call_operand.hbm [shape: f32[16,32], index: 3, kind: output, shape index: {}]  }
   0x1   :  { %v23_v0 = vld [vmem:[%s372_s1 + $0x30] sm:$0xff]  ;;  %v21_v1 = vld [vmem:[%s372_s1 + $0x20] sm:$0xff]  ;;  %v24_v3 = vld [vmem:[%s372_s1 + $0x38] sm:$0xff] }
   0x2   :  { %44 = vmatpush.msra.mxu0 %v23_v0  ;;  %v19_v2 = vld [vmem:[%s372_s1 + $0x10] sm:$0xff]  ;;  %v22_v4 = vld [vmem:[%s372_s1 + $0x28] sm:$0xff]  ;;  %67 = vmatpush.msra.mxu1 %v24_v3 }
   0x4   :  { %45 = vmatpush.msra.mxu0 %v21_v1 }
   0x5   :  { %8 = vsyncpa [#allocation4], 0  ;;  %v17_v5 = vld [vmem:[%s372_s1] sm:$0xff]  ;;  %v20_v6 = vld [vmem:[%s372_s1 + $0x18] sm:$0xff]  ;;  %vm25_vm0 = vcmask 261120   ;;  %68 = vmatpush.msra.mxu1 %v22_v4  ;;  %s260_s10 = smov 128  }
   0x6   :  { %46 = vmatpush.msra.mxu0 %v19_v2  ;;  %v15_v7 = vld [vmem:[%s371_s0] sm:$0xff]  ;;  %v18_v8 = vld [vmem:[%s372_s1 + $0x8] sm:$0xff]  ;;  %v135_v10 = vld [vmem:[%s373_s2 + $0x78] sm:$0xff]  ;;  %s261_s11 = smov 8  }
   0x7   :  { %69 = vmatpush.msra.mxu1 %v20_v6  ;;  %v16_v9 = vld [vmem:[%s371_s0 + $0x8] sm:$0xff]  ;;  %136 = vmatpush.msra.mxu2 %v135_v10  ;;  %v134_v11 = vld [vmem:[%s373_s2 + $0x70] sm:$0xff]  ;;  %v132_v13 = vld [vmem:[%s373_s2 + $0x60] sm:$0xff]  ;;  %s188_s0 = sshll.u32 %s374_s3, 4  ;;  %s189_s0 = int_to_ptr.hbm [resolvable:$true] %s188_s0 }
   0x8   :  { %47 = vmatpush.msra.mxu0 %v17_v5  ;;  %206 = vmatpush.msra.mxu3 %v135_v10  ;;  %v133_v12 = vld [vmem:[%s373_s2 + $0x68] sm:$0xff]  ;;  %v131_v14 = vld [vmem:[%s373_s2 + $0x58] sm:$0xff]  ;;  %v130_v15 = vld [vmem:[%s373_s2 + $0x50] sm:$0xff] }
   0x9   :  { %200 = vmatmul.msk.f32.vlgmr.msra.gmra.mxu0 %vm25_vm0, %v15_v7  ;;  %70 = vmatpush.msra.mxu1 %v18_v8  ;;  %v129_v16 = vld [vmem:[%s373_s2 + $0x48] sm:$0xff]  ;;  %v128_v17 = vld [vmem:[%s373_s2 + $0x40] sm:$0xff]  ;;  %v127_v18 = vld [vmem:[%s373_s2 + $0x38] sm:$0xff] }
   0xa   :  { %202 = vmatmul.msk.f32.vlgmr.msra.gmra.mxu1 %vm25_vm0, %v15_v7  ;;  %137 = vmatpush.msra.mxu2 %v134_v11  ;;  %v126_v19 = vld [vmem:[%s373_s2 + $0x30] sm:$0xff]  ;;  %v125_v20 = vld [vmem:[%s373_s2 + $0x28] sm:$0xff]  ;;  %v124_v21 = vld [vmem:[%s373_s2 + $0x20] sm:$0xff] }
   0xb   :  { %207 = vmatpush.msra.mxu3 %v134_v11  ;;  %v123_v22 = vld [vmem:[%s373_s2 + $0x18] sm:$0xff]  ;;  %v122_v23 = vld [vmem:[%s373_s2 + $0x10] sm:$0xff]  ;;  %v121_v24 = vld [vmem:[%s373_s2 + $0x8] sm:$0xff] }
   0xc   :  { %138 = vmatpush.msra.mxu2 %v133_v12  ;;  %v120_v25 = vld [vmem:[%s373_s2] sm:$0xff]  ;;  %s259_s2 = smov [#allocation3]  }
   0xd   :  { %208 = vmatpush.msra.mxu3 %v133_v12  ;;  %s186_s7 = sshll.u32 %s259_s2, 4  ;;  %s187_s7 = int_to_ptr.vmem [resolvable:$true] %s186_s7 }
   0xe   :  { %139 = vmatpush.msra.mxu2 %v132_v13 }
   0xf   :  { %209 = vmatpush.msra.mxu3 %v132_v13 }
  0x10   :  { %140 = vmatpush.msra.mxu2 %v131_v14 }
  0x11   :  { %201 = vmatmul.msk.f32.gmra.mxu0 %vm25_vm0, %v16_v9  ;;  %210 = vmatpush.msra.mxu3 %v131_v14 }
  0x12   :  { %203 = vmatmul.msk.f32.gmra.mxu1 %vm25_vm0, %v16_v9  ;;  %141 = vmatpush.msra.mxu2 %v130_v15 }
  0x13   :  { %211 = vmatpush.msra.mxu3 %v130_v15 }
  0x14   :  { %142 = vmatpush.msra.mxu2 %v129_v16 }
  0x15   :  { %212 = vmatpush.msra.mxu3 %v129_v16 }
  0x16   :  { %143 = vmatpush.msra.mxu2 %v128_v17 }
  0x17   :  { %213 = vmatpush.msra.mxu3 %v128_v17 }
  0x18   :  { %144 = vmatpush.msra.mxu2 %v127_v18 }
  0x19   :  { %214 = vmatpush.msra.mxu3 %v127_v18 }
  0x1a   :  { %145 = vmatpush.msra.mxu2 %v126_v19 }
  0x1b   :  { %215 = vmatpush.msra.mxu3 %v126_v19 }
  0x1c   :  { %146 = vmatpush.msra.mxu2 %v125_v20 }
  0x1d   :  { %216 = vmatpush.msra.mxu3 %v125_v20 }
  0x1e   :  { %147 = vmatpush.msra.mxu2 %v124_v21 }
  0x1f   :  { %217 = vmatpush.msra.mxu3 %v124_v21 }
  0x20   :  { %148 = vmatpush.msra.mxu2 %v123_v22 }
  0x21   :  { %218 = vmatpush.msra.mxu3 %v123_v22 }
  0x22   :  { %149 = vmatpush.msra.mxu2 %v122_v23 }
  0x23   :  { %219 = vmatpush.msra.mxu3 %v122_v23 }
  0x24   :  { %150 = vmatpush.msra.mxu2 %v121_v24 }
  0x25   :  { %220 = vmatpush.msra.mxu3 %v121_v24 }
  0x26   :  { %151 = vmatpush.msra.mxu2 %v120_v25 }
  0x27   :  { %221 = vmatpush.msra.mxu3 %v120_v25 }
  0x86   :  { %v49_v26 = vpop.f32.mrf.mxu0 }
  0x87   :  { %v204_v27 = vmul.f32 -1.442695, %v49_v26  ;;  %v72_v43 = vpop.f32.mrf.mxu1 }
  0x89   :  { %225 = vpow2.f32 %v204_v27 }
  0x8e   :  { %v52_v28 = vpop.f32.mrf.mxu0 }
  0x8f   :  { %v226_v29 = vpop.eup %225  ;;  %v205_v30 = vmul.f32 -1.442695, %v52_v28  ;;  %v75_v57 = vpop.f32.mrf.mxu1 }
  0x90   :  { %v84_v31 = vadd.f32 1.0, %v226_v29 }
  0x91   :  { %227 = vpow2.f32 %v205_v30 }
  0x92   :  { %229 = vrcp.f32 %v84_v31  ;;  %v97_v37 = vand.u32 2147483648, %v84_v31  ;;  %v95_v39 = vand.u32 2147483647, %v84_v31  ;;  %vm91_vm2 = vweird.f32 %v84_v31 }
  0x94   :  { %v98_v42 = vor.u32 1.1754944e-38, %v97_v37  ;;  %vm96_vm4 = vcmp.eq.f32.partialorder %v95_v39, 8.507059e+37 }
  0x97   :  { %v228_v32 = vpop.eup %227 }
  0x98   :  { %v230_v33 = vpop.eup %229  ;;  %v85_v34 = vadd.f32 1.0, %v228_v32 }
  0x99   :  { %v87_v35 = vmul.f32 %v230_v33, %v84_v31  ;;  %vm92_vm1 = vweird.f32 %v230_v33 }
  0x9a   :  { %231 = vrcp.f32 %v85_v34  ;;  %vm93_vm3 = vmor %vm91_vm2, %vm92_vm1  ;;  %v112_v49 = vand.u32 2147483648, %v85_v34  ;;  %v110_v51 = vand.u32 2147483647, %v85_v34  ;;  %vm106_vm6 = vweird.f32 %v85_v34 }
  0x9b   :  { %v88_v36 = vsub.f32 1.0, %v87_v35 }
  0x9c   :  { %v113_v54 = vor.u32 1.1754944e-38, %v112_v49  ;;  %vm111_vm8 = vcmp.eq.f32.partialorder %v110_v51, 8.507059e+37 }
  0x9d   :  { %v89_v38 = vmul.f32 %v230_v33, %v88_v36 }
  0x9f   :  { %v90_v40 = vadd.f32 %v230_v33, %v89_v38 }
  0xa0   :  { %v232_v41 = vpop.eup %231 }
  0xa1   :  { %v94_v44 = vsel %vm93_vm3, %v230_v33, %v90_v40  ;;  %v102_v45 = vmul.f32 %v232_v41, %v85_v34  ;;  %vm107_vm5 = vweird.f32 %v232_v41 }
  0xa2   :  { %v99_v46 = vsel %vm96_vm4, %v98_v42, %v94_v44  ;;  %vm108_vm7 = vmor %vm106_vm6, %vm107_vm5 }
  0xa3   :  { %v116_v47 = vmul.f32 %v99_v46, %v49_v26  ;;  %v103_v48 = vsub.f32 1.0, %v102_v45 }
  0xa5   :  { %v104_v50 = vmul.f32 %v232_v41, %v103_v48  ;;  %v118_v52 = vmul.f32 %v116_v47, %v72_v43 }
  0xa7   :  { %v105_v53 = vadd.f32 %v232_v41, %v104_v50  ;;  %152 = vmatmul.f32.vlgmr.msra.gmra.mxu2 %v118_v52 }
  0xa9   :  { %v109_v55 = vsel %vm108_vm7, %v232_v41, %v105_v53 }
  0xaa   :  { %v114_v56 = vsel %vm111_vm8, %v113_v54, %v109_v55 }
  0xab   :  { %v117_v58 = vmul.f32 %v114_v56, %v52_v28 }
  0xad   :  { %v119_v59 = vmul.f32 %v117_v58, %v75_v57 }
  0xaf   :  { %155 = vmatmul.f32.vlgmr.msra.gmra.mxu3 %v119_v59 }
 0x12a   :  { %v153_v60 = vpop.f32.mrf.mxu2 }
 0x12b   :  { %163 = vst.msk [vmem:[#allocation2] sm:$0xff] %vm25_vm0, %v153_v60 }
 0x132   :  { %v156_v61 = vpop.f32.mrf.mxu3  ;;  %v178_v62 = vld [vmem:[#allocation2] sm:$0xff] }
 0x133   :  { %164 = vst.msk [vmem:[#allocation2 + $0x8] sm:$0xff] %vm25_vm0, %v156_v61 }
 0x134   :  { %180 = vst.msk [vmem:[#allocation3] sm:$0xff] %vm25_vm0, %v178_v62 }
 0x13a   :  { %v179_v63 = vld [vmem:[#allocation2 + $0x8] sm:$0xff] }
 0x13b   :  { %181 = vst.msk [vmem:[#allocation3 + $0x8] sm:$0xff] %vm25_vm0, %v179_v63 }
 0x13c   :  { %194 = dma.vmem_to_hbm [thread:$0]  %s187_s7, 256, %s189_s0, [#allocation4], %s260_s10, %s260_s10, %s261_s11  }
 0x13d   :  { %257 = dma.done.wait [#allocation4], 256  }
 0x13e   :  { %258 = vsyncadd [#allocation4], 4294967040 }
 0x13f   :  { %199 = vsyncpa [#allocation4], 1 }

</bundles_post_ra>
